<compile_context>
chip_gen: v6e
topology: v6e:2x2x1
jax: 0.10.0
libtpu: 0.0.40
codegen_flags: <defaults>
</compile_context>

<pallas_src>
import functools

import jax
import jax.numpy as jnp
from jax import lax
from jax.experimental import pallas as pl
from jax.experimental.pallas import tpu as pltpu

CONSISTENCY_WEIGHT = 0.1
_NORM_EPS = 1e-12                  # F.normalize default eps
_NORM_EPS_SQ = _NORM_EPS * _NORM_EPS


def _aigc_loss_kernel(py_ref, sem_ref, tex_ref, res_ref, acc_ref,
                      *, inv_batch, consistency_weight):
    """One B-tile per grid step; scalar partials accumulated in SMEM scratch.

    py_ref : (TB, 2) f32 VMEM   col 0 = outputs (probabilities), col 1 = labels
    sem_ref: (TB, D) VMEM       semantic features (native dtype, cast in-kernel)
    tex_ref: (TB, D) VMEM       texture features
    res_ref: (3,)   f32 SMEM    [total, classification, consistency]
    acc_ref: (3,)   f32 SMEM    [bce_sum, masked_cos_sum, real_count]
    """
    i = pl.program_id(0)

    @pl.when(i == 0)
    def _init():
        acc_ref[0] = 0.0
        acc_ref[1] = 0.0
        acc_ref[2] = 0.0

    # ---- classification loss partial: binary cross entropy ----------------
    py = py_ref[...]                              # (TB, 2), one DMA for both
    p = jnp.clip(py[:, 0:1], 0.0, 1.0)            # guard log() (see header note)
    y = py[:, 1:2]
    # PyTorch's binary_cross_entropy clamps each log term at -100.
    log_p = jnp.maximum(jnp.log(p), -100.0)
    log_1mp = jnp.maximum(jnp.log(1.0 - p), -100.0)
    bce = -(y * log_p + (1.0 - y) * log_1mp)      # (TB, 1)

    # ---- consistency partial over "real" samples (labels == 0) ------------
    # cos(sem, tex) = <sem,tex> * rsqrt(max(||sem||^2,eps^2)*max(||tex||^2,eps^2))
    # Three fused row reductions over (TB, D); per-row scalar math on the EUP.
    # Kept off the MXU on purpose (diag-of-Gram would waste B x the FLOPs).
    sem = sem_ref[...].astype(jnp.float32)        # inputs may be bf16
    tex = tex_ref[...].astype(jnp.float32)

    ss = jnp.sum(sem * sem, axis=1, keepdims=True)   # (TB, 1)  ||sem||^2
    tt = jnp.sum(tex * tex, axis=1, keepdims=True)   # (TB, 1)  ||tex||^2
    st = jnp.sum(sem * tex, axis=1, keepdims=True)   # (TB, 1)  <sem, tex>

    # max(sqrt(a),eps)*max(sqrt(b),eps) == sqrt(max(a,eps^2)*max(b,eps^2)) for
    # a,b >= 0.  Single rsqrt; ss*tt stays in f32 range for any realistic
    # feature magnitudes (overflow only if both norms exceed ~1e9).
    inv_norm = lax.rsqrt(jnp.maximum(ss, _NORM_EPS_SQ) *
                         jnp.maximum(tt, _NORM_EPS_SQ))
    cos = st * inv_norm                              # (TB, 1)

    # Mask derived in-kernel from labels — same (TB, 1) layout as cos, so the
    # masked reduction needs no transpose.  Padded rows carry label 1.0.
    real_mask = jnp.where(y == 0.0, 1.0, 0.0)        # (TB, 1)

    acc_ref[0] += jnp.sum(bce)
    acc_ref[1] += jnp.sum(real_mask * cos)
    acc_ref[2] += jnp.sum(real_mask)

    # ---- finalize on the last tile ----------------------------------------
    @pl.when(i == pl.num_programs(0) - 1)
    def _finalize():
        cls_loss = acc_ref[0] * inv_batch            # mean over the *original* B
        real_count = acc_ref[2]
        mean_cos = acc_ref[1] / jnp.maximum(real_count, 1.0)
        cons_loss = jnp.where(real_count > 0.0, 1.0 - mean_cos, 0.0)
        res_ref[0] = cls_loss + consistency_weight * cons_loss
        res_ref[1] = cls_loss
        res_ref[2] = cons_loss


def _feature_tile_budget_bytes():
    """VMEM budget for the double-buffered feature tiles (2 inputs x 2 bufs).

    Generation-aware: v7x has 64 MiB physical VMEM (32 MiB scoped default),
    v5e/v6e have 128 MiB (16/32 MiB scoped defaults).  capacity//8 keeps us
    under the smallest scoped default everywhere without a vmem_limit override.
    """
    try:
        cap = pltpu.get_tpu_info().vmem_capacity_bytes
    except Exception:
        cap = 64 * 1024 * 1024
    return min(cap // 8, 12 * 1024 * 1024)


def aigc_detection_loss(outputs, labels, semantic_features, texture_features,
                        consistency_weight=CONSISTENCY_WEIGHT):
    """Returns (total_loss, classification_loss, consistency_loss) scalars."""
    outputs = outputs.reshape(-1)
    labels = labels.reshape(-1)
    b = int(outputs.shape[0])
    d = int(semantic_features.shape[-1])
    feat_dtype = semantic_features.dtype
    itemsize = jnp.dtype(feat_dtype).itemsize

    # Pack per-sample scalars into ONE lane-packed (B, 2) array: one DMA for
    # both, and the labels column lands in the same (B, 1) layout as the
    # per-row cosines, so the real-mask is derived in-kernel for free.
    packed = jnp.stack(
        [outputs.astype(jnp.float32), labels.astype(jnp.float32)], axis=1)

    # ---- B-tile selection (generation-aware VMEM budget) -------------------
    budget = _feature_tile_budget_bytes()
    tb_max = max(8, (budget // (4 * d * itemsize)) // 8 * 8)
    if b <= tb_max:
        tb, b_pad = b, b                      # grid of 1 — effectively gridless
    else:
        tb = tb_max
        b_pad = ((b + tb - 1) // tb) * tb

    sem, tex = semantic_features, texture_features
    if b_pad != b:
        pad = b_pad - b
        # Padding is loss-neutral: outputs=1, labels=1 -> bce term 0 and the
        # row is excluded from the real mask; zero feature rows are harmless.
        packed = jnp.concatenate([packed, jnp.ones((pad, 2), jnp.float32)], axis=0)
        sem = jnp.concatenate([sem, jnp.zeros((pad, d), feat_dtype)], axis=0)
        tex = jnp.concatenate([tex, jnp.zeros((pad, d), feat_dtype)], axis=0)

    num_tiles = b_pad // tb

    feat_bytes = sem.size * sem.dtype.itemsize + tex.size * tex.dtype.itemsize
    cost = pl.CostEstimate(
        flops=6 * b_pad * d + 20 * b_pad,    # 3 fused row reductions + per-row/BCE math
        transcendentals=3 * b_pad,           # 2 logs + 1 rsqrt per sample
        bytes_accessed=feat_bytes + packed.size * 4 + 3 * 4,
    )

    kernel = functools.partial(
        _aigc_loss_kernel,
        inv_batch=1.0 / float(b),
        consistency_weight=float(consistency_weight))

    res = pl.pallas_call(
        kernel,
        out_shape=jax.ShapeDtypeStruct((3,), jnp.float32),
        grid_spec=pltpu.PrefetchScalarGridSpec(
            num_scalar_prefetch=0,
            grid=(num_tiles,),
            in_specs=[
                pl.BlockSpec((tb, 2), lambda i: (i, 0)),   # packed outputs/labels
                pl.BlockSpec((tb, d), lambda i: (i, 0)),   # semantic features
                pl.BlockSpec((tb, d), lambda i: (i, 0)),   # texture features
            ],
            out_specs=pl.BlockSpec(memory_space=pltpu.MemorySpace.SMEM),
            scratch_shapes=[pltpu.SMEM((3,), jnp.float32)],
        ),
        compiler_params=pltpu.CompilerParams(
            dimension_semantics=("arbitrary",)),   # reduction axis: accumulators persist
        cost_estimate=cost,
    )(packed, sem, tex)
    return res[0], res[1], res[2]


def _reference(outputs, labels, sem, tex, w=CONSISTENCY_WEIGHT):
    """Pure-JAX reference matching the PyTorch module."""
    p = outputs.astype(jnp.float32)
    y = labels.astype(jnp.float32)
    log_p = jnp.maximum(jnp.log(p), -100.0)
    log_1mp = jnp.maximum(jnp.log(1.0 - p), -100.0)
    cls = jnp.mean(-(y * log_p + (1.0 - y) * log_1mp))

    sem = sem.astype(jnp.float32)
    tex = tex.astype(jnp.float32)
    sem_n = sem / jnp.maximum(jnp.linalg.norm(sem, axis=1, keepdims=True), _NORM_EPS)
    tex_n = tex / jnp.maximum(jnp.linalg.norm(tex, axis=1, keepdims=True), _NORM_EPS)
    cos = jnp.sum(sem_n * tex_n, axis=1)
    mask = (y == 0.0).astype(jnp.float32)
    cnt = jnp.sum(mask)
    cons = jnp.where(cnt > 0.0, 1.0 - jnp.sum(mask * cos) / jnp.maximum(cnt, 1.0), 0.0)
    return cls + w * cons, cls, cons


if __name__ == "__main__":
    key = jax.random.PRNGKey(0)
    k1, k2, k3, k4 = jax.random.split(key, 4)

    B, D = 8, 32  # small shapes consistent with the module's forward

    # Model outputs are probabilities in (0, 1).
    outputs = jax.nn.sigmoid(jax.random.normal(k1, (B,), dtype=jnp.float32))
    # Labels: 0 = real, 1 = AI-generated (ensure both classes present).
    labels = (jax.random.uniform(k2, (B,)) > 0.5).astype(jnp.float32)
    labels = labels.at[0].set(0.0).at[1].set(1.0)

    semantic_features = jax.random.normal(k3, (B, D), dtype=jnp.float32)
    texture_features = jax.random.normal(k4, (B, D), dtype=jnp.float32)

    total, cls_l, cons_l = aigc_detection_loss(
        outputs, labels, semantic_features, texture_features
    )
    jax.block_until_ready((total, cls_l, cons_l))

    # Correctness check against the pure-JAX reference.
    ref_total, ref_cls, ref_cons = _reference(
        outputs, labels, semantic_features, texture_features
    )
    assert jnp.allclose(total, ref_total, rtol=1e-5, atol=1e-5), (total, ref_total)
    assert jnp.allclose(cls_l, ref_cls, rtol=1e-5, atol=1e-5), (cls_l, ref_cls)
    assert jnp.allclose(cons_l, ref_cons, rtol=1e-5, atol=1e-5), (cons_l, ref_cons)

    print("KERNEL_OK")
</pallas_src>

<mosaic_0001>
module attributes {stable_mosaic.version = 11 : i64} {
  func.func @_aigc_loss_kernel(%arg0: i32, %arg1: memref<8x2xf32, #tpu.memory_space<vmem>>, %arg2: memref<8x32xf32, #tpu.memory_space<vmem>>, %arg3: memref<8x32xf32, #tpu.memory_space<vmem>>, %arg4: memref<3xf32, #tpu.memory_space<smem>>, %arg5: memref<3xf32, #tpu.memory_space<smem>>) attributes {dimension_semantics = [#tpu.dimension_semantics<arbitrary>], iteration_bounds = array<i64: 1>, scalar_prefetch = 0 : i64, scratch_operands = 1 : i64, tpu.core_type = #tpu.core_type<tc>, window_params = [{transform_indices = @transform_0, window_bounds = array<i64: 8, 2>}, {transform_indices = @transform_1, window_bounds = array<i64: 8, 32>}, {transform_indices = @transform_2, window_bounds = array<i64: 8, 32>}, {transform_indices = @transform_3, window_bounds = array<i64: 3>}]} {
    %c0_i32 = arith.constant 0 : i32
    %0 = arith.cmpi eq, %arg0, %c0_i32 : i32
    %1 = arith.extui %0 : i1 to i32
    %c0_i32_0 = arith.constant 0 : i32
    %2 = arith.cmpi ne, %1, %c0_i32_0 : i32
    scf.if %2 {
      %cst_29 = arith.constant 0.000000e+00 : f32
      %c0_30 = arith.constant 0 : index
      %73 = memref.load %arg5[%c0_30] : memref<3xf32, #tpu.memory_space<smem>>
      memref.store %cst_29, %arg5[%c0_30] : memref<3xf32, #tpu.memory_space<smem>>
      %cst_31 = arith.constant 0.000000e+00 : f32
      %c1_32 = arith.constant 1 : index
      %74 = memref.load %arg5[%c1_32] : memref<3xf32, #tpu.memory_space<smem>>
      memref.store %cst_31, %arg5[%c1_32] : memref<3xf32, #tpu.memory_space<smem>>
      %cst_33 = arith.constant 0.000000e+00 : f32
      %c2_34 = arith.constant 2 : index
      %75 = memref.load %arg5[%c2_34] : memref<3xf32, #tpu.memory_space<smem>>
      memref.store %cst_33, %arg5[%c2_34] : memref<3xf32, #tpu.memory_space<smem>>
    } else {
    }
    %c0 = arith.constant 0 : index
    %c0_1 = arith.constant 0 : index
    %3 = vector.load %arg1[%c0, %c0_1] : memref<8x2xf32, #tpu.memory_space<vmem>>, vector<8x2xf32>
    %4 = vector.extract_strided_slice %3 {offsets = [0, 0], sizes = [8, 1], strides = [1, 1]} : vector<8x2xf32> to vector<8x1xf32>
    %cst = arith.constant 0.000000e+00 : f32
    %cst_2 = arith.constant 1.000000e+00 : f32
    %5 = vector.broadcast %cst : f32 to vector<8x1xf32>
    %6 = arith.maximumf %5, %4 : vector<8x1xf32>
    %7 = vector.broadcast %cst_2 : f32 to vector<8x1xf32>
    %8 = arith.minimumf %7, %6 : vector<8x1xf32>
    %9 = vector.extract_strided_slice %3 {offsets = [0, 1], sizes = [8, 1], strides = [1, 1]} : vector<8x2xf32> to vector<8x1xf32>
    %10 = math.log %8 : vector<8x1xf32>
    %cst_3 = arith.constant -1.000000e+02 : f32
    %11 = vector.broadcast %cst_3 : f32 to vector<8x1xf32>
    %12 = arith.maximumf %10, %11 : vector<8x1xf32>
    %cst_4 = arith.constant 1.000000e+00 : f32
    %13 = vector.broadcast %cst_4 : f32 to vector<8x1xf32>
    %14 = arith.subf %13, %8 : vector<8x1xf32>
    %15 = math.log %14 : vector<8x1xf32>
    %cst_5 = arith.constant -1.000000e+02 : f32
    %16 = vector.broadcast %cst_5 : f32 to vector<8x1xf32>
    %17 = arith.maximumf %15, %16 : vector<8x1xf32>
    %18 = arith.mulf %9, %12 : vector<8x1xf32>
    %cst_6 = arith.constant 1.000000e+00 : f32
    %19 = vector.broadcast %cst_6 : f32 to vector<8x1xf32>
    %20 = arith.subf %19, %9 : vector<8x1xf32>
    %21 = arith.mulf %20, %17 : vector<8x1xf32>
    %22 = arith.addf %18, %21 : vector<8x1xf32>
    %cst_7 = arith.constant 0.000000e+00 : f32
    %23 = vector.broadcast %cst_7 : f32 to vector<8x1xf32>
    %24 = arith.subf %23, %22 : vector<8x1xf32>
    %c0_8 = arith.constant 0 : index
    %c0_9 = arith.constant 0 : index
    %25 = vector.load %arg2[%c0_8, %c0_9] : memref<8x32xf32, #tpu.memory_space<vmem>>, vector<8x32xf32>
    %c0_10 = arith.constant 0 : index
    %c0_11 = arith.constant 0 : index
    %26 = vector.load %arg3[%c0_10, %c0_11] : memref<8x32xf32, #tpu.memory_space<vmem>>, vector<8x32xf32>
    %27 = arith.mulf %25, %25 : vector<8x32xf32>
    %cst_12 = arith.constant dense<0.000000e+00> : vector<8xf32>
    %28 = vector.multi_reduction <add>, %27, %cst_12 [1] : vector<8x32xf32> to vector<8xf32>
    %29 = vector.shape_cast %28 : vector<8xf32> to vector<8x1xf32>
    %30 = arith.mulf %26, %26 : vector<8x32xf32>
    %cst_13 = arith.constant dense<0.000000e+00> : vector<8xf32>
    %31 = vector.multi_reduction <add>, %30, %cst_13 [1] : vector<8x32xf32> to vector<8xf32>
    %32 = vector.shape_cast %31 : vector<8xf32> to vector<8x1xf32>
    %33 = arith.mulf %25, %26 : vector<8x32xf32>
    %cst_14 = arith.constant dense<0.000000e+00> : vector<8xf32>
    %34 = vector.multi_reduction <add>, %33, %cst_14 [1] : vector<8x32xf32> to vector<8xf32>
    %35 = vector.shape_cast %34 : vector<8xf32> to vector<8x1xf32>
    %cst_15 = arith.constant 1.000000e-24 : f32
    %36 = vector.broadcast %cst_15 : f32 to vector<8x1xf32>
    %37 = arith.maximumf %29, %36 : vector<8x1xf32>
    %cst_16 = arith.constant 1.000000e-24 : f32
    %38 = vector.broadcast %cst_16 : f32 to vector<8x1xf32>
    %39 = arith.maximumf %32, %38 : vector<8x1xf32>
    %40 = arith.mulf %37, %39 : vector<8x1xf32>
    %41 = math.rsqrt %40 : vector<8x1xf32>
    %42 = arith.mulf %35, %41 : vector<8x1xf32>
    %cst_17 = arith.constant 0.000000e+00 : f32
    %43 = vector.broadcast %cst_17 : f32 to vector<8x1xf32>
    %44 = arith.cmpf oeq, %9, %43 : vector<8x1xf32>
    %cst_18 = arith.constant 1.000000e+00 : f32
    %cst_19 = arith.constant 0.000000e+00 : f32
    %45 = vector.broadcast %cst_18 : f32 to vector<8x1xf32>
    %46 = vector.broadcast %cst_19 : f32 to vector<8x1xf32>
    %47 = arith.select %44, %45, %46 : vector<8x1xi1>, vector<8x1xf32>
    %c0_20 = arith.constant 0 : index
    %48 = memref.load %arg5[%c0_20] : memref<3xf32, #tpu.memory_space<smem>>
    %49 = vector.shape_cast %24 : vector<8x1xf32> to vector<1x8x1xf32>
    %cst_21 = arith.constant dense<0.000000e+00> : vector<1xf32>
    %50 = vector.multi_reduction <add>, %49, %cst_21 [1, 2] : vector<1x8x1xf32> to vector<1xf32>
    %51 = vector.shape_cast %50 : vector<1xf32> to vector<1x1x1xf32>
    %52 = vector.extract %51[0, 0, 0] : f32 from vector<1x1x1xf32>
    %53 = arith.addf %48, %52 : f32
    %c0_22 = arith.constant 0 : index
    %54 = memref.load %arg5[%c0_22] : memref<3xf32, #tpu.memory_space<smem>>
    memref.store %53, %arg5[%c0_22] : memref<3xf32, #tpu.memory_space<smem>>
    %c1 = arith.constant 1 : index
    %55 = memref.load %arg5[%c1] : memref<3xf32, #tpu.memory_space<smem>>
    %56 = arith.mulf %47, %42 : vector<8x1xf32>
    %57 = vector.shape_cast %56 : vector<8x1xf32> to vector<1x8x1xf32>
    %cst_23 = arith.constant dense<0.000000e+00> : vector<1xf32>
    %58 = vector.multi_reduction <add>, %57, %cst_23 [1, 2] : vector<1x8x1xf32> to vector<1xf32>
    %59 = vector.shape_cast %58 : vector<1xf32> to vector<1x1x1xf32>
    %60 = vector.extract %59[0, 0, 0] : f32 from vector<1x1x1xf32>
    %61 = arith.addf %55, %60 : f32
    %c1_24 = arith.constant 1 : index
    %62 = memref.load %arg5[%c1_24] : memref<3xf32, #tpu.memory_space<smem>>
    memref.store %61, %arg5[%c1_24] : memref<3xf32, #tpu.memory_space<smem>>
    %c2 = arith.constant 2 : index
    %63 = memref.load %arg5[%c2] : memref<3xf32, #tpu.memory_space<smem>>
    %64 = vector.shape_cast %47 : vector<8x1xf32> to vector<1x8x1xf32>
    %cst_25 = arith.constant dense<0.000000e+00> : vector<1xf32>
    %65 = vector.multi_reduction <add>, %64, %cst_25 [1, 2] : vector<1x8x1xf32> to vector<1xf32>
    %66 = vector.shape_cast %65 : vector<1xf32> to vector<1x1x1xf32>
    %67 = vector.extract %66[0, 0, 0] : f32 from vector<1x1x1xf32>
    %68 = arith.addf %63, %67 : f32
    %c2_26 = arith.constant 2 : index
    %69 = memref.load %arg5[%c2_26] : memref<3xf32, #tpu.memory_space<smem>>
    memref.store %68, %arg5[%c2_26] : memref<3xf32, #tpu.memory_space<smem>>
    %c0_i32_27 = arith.constant 0 : i32
    %70 = arith.cmpi eq, %arg0, %c0_i32_27 : i32
    %71 = arith.extui %70 : i1 to i32
    %c0_i32_28 = arith.constant 0 : i32
    %72 = arith.cmpi ne, %71, %c0_i32_28 : i32
    scf.if %72 {
      %c0_29 = arith.constant 0 : index
      %73 = memref.load %arg5[%c0_29] : memref<3xf32, #tpu.memory_space<smem>>
      %cst_30 = arith.constant 1.250000e-01 : f32
      %74 = arith.mulf %73, %cst_30 : f32
      %c2_31 = arith.constant 2 : index
      %75 = memref.load %arg5[%c2_31] : memref<3xf32, #tpu.memory_space<smem>>
      %c1_32 = arith.constant 1 : index
      %76 = memref.load %arg5[%c1_32] : memref<3xf32, #tpu.memory_space<smem>>
      %cst_33 = arith.constant 1.000000e+00 : f32
      %77 = arith.maximumf %75, %cst_33 : f32
      %78 = arith.divf %76, %77 : f32
      %cst_34 = arith.constant 0.000000e+00 : f32
      %79 = arith.cmpf ogt, %75, %cst_34 : f32
      %cst_35 = arith.constant 1.000000e+00 : f32
      %80 = arith.subf %cst_35, %78 : f32
      %cst_36 = arith.constant 0.000000e+00 : f32
      %81 = arith.select %79, %80, %cst_36 : f32
      %cst_37 = arith.constant 1.000000e-01 : f32
      %82 = arith.mulf %cst_37, %81 : f32
      %83 = arith.addf %74, %82 : f32
      %c0_38 = arith.constant 0 : index
      %84 = memref.load %arg4[%c0_38] : memref<3xf32, #tpu.memory_space<smem>>
      memref.store %83, %arg4[%c0_38] : memref<3xf32, #tpu.memory_space<smem>>
      %c1_39 = arith.constant 1 : index
      %85 = memref.load %arg4[%c1_39] : memref<3xf32, #tpu.memory_space<smem>>
      memref.store %74, %arg4[%c1_39] : memref<3xf32, #tpu.memory_space<smem>>
      %c2_40 = arith.constant 2 : index
      %86 = memref.load %arg4[%c2_40] : memref<3xf32, #tpu.memory_space<smem>>
      memref.store %81, %arg4[%c2_40] : memref<3xf32, #tpu.memory_space<smem>>
    } else {
    }
    return
  }
  func.func @transform_0(%arg0: i32) -> (i32, i32) {
    %c0_i32 = arith.constant 0 : i32
    %c0_i32_0 = arith.constant 0 : i32
    return %arg0, %c0_i32 : i32, i32
  }
  func.func @transform_1(%arg0: i32) -> (i32, i32) {
    %c0_i32 = arith.constant 0 : i32
    %c0_i32_0 = arith.constant 0 : i32
    return %arg0, %c0_i32 : i32, i32
  }
  func.func @transform_2(%arg0: i32) -> (i32, i32) {
    %c0_i32 = arith.constant 0 : i32
    %c0_i32_0 = arith.constant 0 : i32
    return %arg0, %c0_i32 : i32, i32
  }
  func.func @transform_3(%arg0: i32) -> i32 {
    %c0_i32 = arith.constant 0 : i32
    %c0_i32_0 = arith.constant 0 : i32
    return %c0_i32 : i32
  }
}

</mosaic_0001>

<bundles_post_ra>
// kernel: tpu_custom_call.1
= control target key start
LH: loop header
LB: loop body
LE: loop exit
PB: predicated region body
PF: predicated region fallthrough
CT: control target
= control target key end

     0   :  { %8 = vsyncpa [#allocation4], 0  ;;  %s271_s0 = inlined_call_operand.vmem [shape: f32[8,2], index: 0, kind: input, shape index: {}]   ;;  %s272_s1 = inlined_call_operand.vmem [shape: f32[8,32], index: 1, kind: input, shape index: {}]   ;;  %s273_s2 = inlined_call_operand.hbm [shape: f32[8,32], index: 2, kind: input, shape index: {}]   ;;  %s274_s3 = inlined_call_operand.hbm [shape: f32[3], index: 3, kind: output, shape index: {}]  }
   0x1   :  { %9 = vsyncpa [#allocation5], 0  ;;  %s233_s12 = smov [#allocation3]  }
   0x2   :  { %s20_s13 = sshll.u32 %s233_s12, 4  ;;  %s21_s13 = int_to_ptr.vmem [resolvable:$true] %s20_s13 }
   0x3   :  { %s209_s14 = scalar_lea.vmem %s21_s13, 128  ;;  %p214_p1 = scmp.lt.s32.totalorder %s21_s13, %s21_s13 }
   0x4   :  { %p210_p0 = scmp.ne.s32.totalorder %s21_s13, %s209_s14  ;;  %p215_p2 = scmp.lt.s32.totalorder %s209_s14, %s209_s14 }
   0x6   :  { %p216_p3 = por %p215_p2, %p214_p1 }
   0x8   :  { %p217_p4 = pnand %p216_p3, %p210_p0 }
   0xa   :  { %220 = shalt.err (!%p217_p4)
}
   0xb   :  { %23 = dma.hbm_to_vmem [thread:$0]  %s273_s2, 128, %s21_s13, [#allocation4]  }
   0xc   :  { %229 = dma.done.wait [#allocation4], 128  }
   0xd   :  { %230 = vsyncadd [#allocation4], 4294967168  ;;  %v60_v0 = vld [vmem:[%s272_s1] sm:$0xff]  ;;  %vm63_vm0 = vcmask 261120   ;;  %s235_s1 = smov 127   ;;  %v236_v32 = vmov 0.0  }
   0xe   :  { %v61_v1 = vld [vmem:[#allocation3] sm:$0xff]  ;;  %v62_v3 = vmul.f32 %v60_v0, %v60_v0  ;;  %vm87_vm2 = vcmask 7168   ;;  %s237_s24 = smov 1.0   ;;  %s238_s4 = smov [#allocation6]  }
   0xf   :  { %v37_v2 = vld [vmem:[%s271_s0] sm:$0xff]  ;;  %v67_v4 = vmul.f32 %v61_v1, %v61_v1  ;;  %v71_v5 = vmul.f32 %v61_v1, %v60_v0  ;;  %s234_s0 = smov 1  }
  0x10   :  { %v38_v6 = vmax.f32 %v37_v2, 0.0  ;;  %v64_v7 = vsel %vm63_vm0, %v62_v3, 0.0  ;;  %v52_v24 = vsub.f32 1.0, %v37_v2  ;;  %vm80_vm1 = vcmp.eq.f32.partialorder %v37_v2, 0.0 }
  0x11   :  { %v72_v8 = vsel %vm63_vm0, %v71_v5, 0.0  ;;  %65 = vadd.xlane.f32.xlu0 %v64_v7  ;;  %v68_v10 = vsel %vm63_vm0, %v67_v4, 0.0  ;;  %v81_v33 = vsel %vm80_vm1, 1.0, %v236_v32 }
  0x12   :  { %v39_v9 = vmin.f32 %v38_v6, 1.0  ;;  %73 = vadd.xlane.f32.xlu1 %v72_v8 }
  0x14   :  { %v43_v11 = vsub.f32 1.0, %v39_v9  ;;  %193 = vlog2.f32 %v39_v9 }
  0x15   :  { %69 = vadd.xlane.f32.xlu0 %v68_v10 }
  0x16   :  { %195 = vlog2.f32 %v43_v11 }
  0x21   :  { %v194_v12 = vpop.eup %193 }
  0x22   :  { %v41_v13 = vmul.f32 0.6931472, %v194_v12 }
  0x23   :  { %v196_v14 = vpop.eup %195 }
  0x24   :  { %v42_v15 = vmax.f32 %v41_v13, -100.0  ;;  %v45_v16 = vmul.f32 0.6931472, %v196_v14 }
  0x26   :  { %48 = vrot.lane.b32.xlu1 %v42_v15, %s234_s0  ;;  %v46_v17 = vmax.f32 %v45_v16, -100.0 }
  0x2b   :  { %54 = vrot.lane.b32.xlu0 %v46_v17, %s234_s0 }
  0x9a   :  { %v66_v18 = vpop.xlane.xlu0 %65 }
  0x9b   :  { %v74_v19 = vpop.xlane.xlu1 %73  ;;  %v75_v22 = vmax.f32 %v66_v18, 1e-24 }
  0x9e   :  { %v70_v20 = vpop.xlane.xlu0 %69 }
  0x9f   :  { %v49_v21 = vpop.permute.xlu1 %48  ;;  %v76_v23 = vmax.f32 %v70_v20, 1e-24 }
  0xa0   :  { %v51_v26 = vmul.f32 %v49_v21, %v37_v2 }
  0xa1   :  { %v77_v25 = vmul.f32 %v76_v23, %v75_v22 }
  0xa2   :  { %v55_v27 = vpop.permute.xlu0 %54 }
  0xa3   :  { %197 = vrsqrt.f32 %v77_v25  ;;  %v57_v28 = vmul.f32 %v55_v27, %v52_v24 }
  0xa5   :  { %v58_v29 = vadd.f32 %v57_v28, %v51_v26 }
  0xa7   :  { %v59_v30 = vsub.f32 0.0, %v58_v29 }
  0xa9   :  { %84 = vrot.lane.b32.xlu1 %v59_v30, %s235_s1 }
  0xb0   :  { %v198_v31 = vpop.eup %197 }
  0xb1   :  { %v79_v34 = vmul.f32 %v198_v31, %v74_v19 }
  0xb3   :  { %v102_v35 = vmul.f32 %v81_v33, %v79_v34 }
  0xb5   :  { %104 = vrot.lane.b32.xlu1 %v102_v35, %s235_s1 }
  0xb9   :  { %122 = vrot.lane.b32.xlu1 %v81_v33, %s235_s1 }
 0x11b   :  { %v85_v36 = vpop.permute.xlu1 %84 }
 0x11c   :  { %v88_v37 = vsel %vm87_vm2, %v85_v36, 0.0 }
 0x11d   :  { %89 = vadd.xlane.f32.xlu0 %v88_v37 }
 0x127   :  { %v105_v38 = vpop.permute.xlu1 %104 }
 0x128   :  { %v107_v39 = vsel %vm87_vm2, %v105_v38, 0.0 }
 0x129   :  { %108 = vadd.xlane.f32.xlu1 %v107_v39 }
 0x12b   :  { %v123_v40 = vpop.permute.xlu1 %122 }
 0x12c   :  { %v125_v41 = vsel %vm87_vm2, %v123_v40, 0.0 }
 0x12d   :  { %126 = vadd.xlane.f32.xlu0 %v125_v41 }
 0x1a6   :  { %v90_v42 = vpop.xlane.xlu0 %89 }
 0x1a7   :  { %v91_v43 = vrot.slane %v90_v42, 4 }
 0x1a9   :  { %v92_v44 = vadd.f32 %v91_v43, %v90_v42 }
 0x1ab   :  { %v93_v45 = vrot.slane %v92_v44, 2 }
 0x1ad   :  { %v94_v46 = vadd.f32 %v93_v45, %v92_v44 }
 0x1af   :  { %v95_v47 = vrot.slane %v94_v46, 1 }
 0x1b1   :  { %v96_v48 = vadd.f32 %v95_v47, %v94_v46 }
 0x1b2   :  { %v109_v49 = vpop.xlane.xlu1 %108 }
 0x1b3   :  { %v110_v50 = vrot.slane %v109_v49, 4  ;;  %179 = vpush %v96_v48 }
 0x1b5   :  { %v111_v51 = vadd.f32 %v110_v50, %v109_v49 }
 0x1b6   :  { %v127_v52 = vpop.xlane.xlu0 %126 }
 0x1b7   :  { %v112_v53 = vrot.slane %v111_v51, 2  ;;  %v128_v54 = vrot.slane %v127_v52, 4 }
 0x1b9   :  { %v113_v55 = vadd.f32 %v112_v53, %v111_v51  ;;  %v129_v56 = vadd.f32 %v128_v54, %v127_v52 }
 0x1bb   :  { %v130_v57 = vrot.slane %v129_v56, 2  ;;  %v114_v58 = vrot.slane %v113_v55, 1 }
 0x1bd   :  { %v131_v59 = vadd.f32 %v130_v57, %v129_v56  ;;  %v115_v60 = vadd.f32 %v114_v58, %v113_v55 }
 0x1bf   :  { %181 = vpush %v115_v60  ;;  %v132_v61 = vrot.slane %v131_v59, 1 }
 0x1c1   :  { %v133_v62 = vadd.f32 %v132_v61, %v131_v59 }
 0x1c3   :  { %183 = vpush %v133_v62 }
 0x1e4   :  { %s180_s2 = spop %179 }
 0x1e5   :  { %s142_s21 = smul.f32 0.125, %s180_s2 }
 0x1e7   :  { %158 = sst [smem:[#allocation6 + $0x1]] %s142_s21 }
 0x1f0   :  { %s182_s22 = spop %181 }
 0x1f4   :  { %s184_s23 = spop %183 }
 0x1f5   :  { %s145_s25 = smax.f32 %s237_s24, %s184_s23  ;;  %p150_p5 = scmp.gt.f32.partialorder %s184_s23, 0.0 }
 0x1f6   :  { %v146_v63 = vstv %s145_s25 }
 0x1f7   :  { %199 = vrcp.f32 %v146_v63 }
 0x204   :  { %v200_v0 = vpop.eup %199 }
 0x205   :  { %185 = vpush %v200_v0 }
 0x236   :  { %s186_s26 = spop %185 }
 0x237   :  { %s149_s27 = smul.f32 %s186_s26, %s182_s22 }
 0x239   :  { %s151_s28 = ssub.f32 1.0, %s149_s27 }
 0x23b   :  { %s276_s28 = smov (!%p150_p5, %s151_s28), 0.0 }
 0x23c   :  { %s153_s29 = smul.f32 0.1, %s276_s28  ;;  %160 = sst [smem:[#allocation6 + $0x2]] %s276_s28 }
 0x23e   :  { %s154_s30 = sadd.f32 %s153_s29, %s142_s21 }
 0x240   :  { %156 = sst [smem:[#allocation6]] %s154_s30 }
 0x241   :  { %168 = dma.smem_to_hbm %s238_s4, 16, %s274_s3, [#allocation5]  }
 0x242   :  { %231 = dma.done.wait [#allocation5], 16  }
 0x243   :  { %232 = vsyncadd [#allocation5], 4294967280 }
 0x244   :  { %172 = sfence }
 0x245   :  { %173 = vsyncpa [#allocation4], 1 }
 0x246   :  { %174 = vsyncpa [#allocation5], 1 }

</bundles_post_ra>
